<compile_context>
chip_gen: v7x
topology: tpu7x:2x2x1
jax: 0.10.0
libtpu: 0.0.40
codegen_flags: <defaults>
</compile_context>

<pallas_src>
import jax
import jax.numpy as jnp
from jax.experimental import pallas as pl
from jax.experimental.pallas import tpu as pltpu


def _pick_m_tile(M, max_tile=4096):
    """Largest multiple of 128 that divides M (capped), else the full M."""
    if M % 128 != 0:
        return M                      # full-extent block is always legal
    tm = min(max_tile, M)
    tm = (tm // 128) * 128
    while M % tm != 0:
        tm -= 128
    return tm


def _inner_bias_pallas(e2, w2, sp_f, spb):
    """inner[h, m] = (sum_k w2[h, k] * e2[k, m]) * (1 / sp_f[0, m]) + spb[h, m].

    e2  : (D*H, M) flattened edge embeddings (lane-dense on M)
    w2  : (H, D*H) distance-mixing weights (contraction over D and input heads)
    sp_f: (1, M)   clamped spatial-pos normalizer (float)
    spb : (H, M)   spatial-pos bias (fused add)
    """
    DH, M = e2.shape
    H = w2.shape[0]
    TM = _pick_m_tile(M)

    def kernel(w_ref, e_ref, sp_ref, spb_ref, out_ref):
        acc = jnp.dot(w_ref[...], e_ref[...],
                      preferred_element_type=jnp.float32)        # (H, TM)
        inv = pl.reciprocal(sp_ref[...], approx=True)            # (1, TM), EUP
        out_ref[...] = acc * inv + spb_ref[...]

    return pl.pallas_call(
        kernel,
        out_shape=jax.ShapeDtypeStruct((H, M), jnp.float32),
        grid_spec=pltpu.PrefetchScalarGridSpec(
            num_scalar_prefetch=0,
            grid=(M // TM,),
            in_specs=[
                pl.BlockSpec((H, DH), lambda i: (0, 0)),
                pl.BlockSpec((DH, TM), lambda i: (0, i)),
                pl.BlockSpec((1, TM), lambda i: (0, i)),
                pl.BlockSpec((H, TM), lambda i: (0, i)),
            ],
            out_specs=pl.BlockSpec((H, TM), lambda i: (0, i)),
        ),
        compiler_params=pltpu.CompilerParams(
            dimension_semantics=("parallel",)),
    )(w2, e2, sp_f, spb)


def _assemble_bias_pallas(attn_bias, inner, t_col):
    """out[g,h] = 2*attn_bias[g] + t on row0/col0, + inner[h,g] at [1:, 1:]."""
    G, Np, _ = attn_bias.shape
    H, _, N, _ = inner.shape

    gb = 1
    for cand in (8, 4, 2, 1):          # pack several graphs per grid step
        if G % cand == 0:
            gb = cand
            break

    def kernel(ab_ref, ib_ref, t_ref, out_ref):
        ab = ab_ref[...]                                          # (gb, Np, Np)
        tv = t_ref[...]                                           # (H, 1)
        row = jax.lax.broadcasted_iota(jnp.int32, (Np, Np), 0)
        col = jax.lax.broadcasted_iota(jnp.int32, (Np, Np), 1)
        mask = ((row == 0) | (col == 0)).astype(jnp.float32)      # (Np, Np)
        tb = tv[:, :, None] * mask[None, :, :]                    # (H, Np, Np)
        # base: 2*attn_bias broadcast over heads + virtual-distance t on row0/col0
        out_ref[...] = 2.0 * ab[:, None, :, :] + tb[None, :, :, :]
        # fused "pad": accumulate the inner bias into the [1:, 1:] sub-window
        ibt = jnp.transpose(ib_ref[...], (1, 0, 2, 3))            # (gb, H, N, N)
        out_ref[:, :, 1:, 1:] += ibt

    return pl.pallas_call(
        kernel,
        out_shape=jax.ShapeDtypeStruct((G, H, Np, Np), jnp.float32),
        grid_spec=pltpu.PrefetchScalarGridSpec(
            num_scalar_prefetch=0,
            grid=(G // gb,),
            in_specs=[
                pl.BlockSpec((gb, Np, Np), lambda i: (i, 0, 0)),
                pl.BlockSpec((H, gb, N, N), lambda i: (0, i, 0, 0)),
                pl.BlockSpec((H, 1), lambda i: (0, 0)),
            ],
            out_specs=pl.BlockSpec((gb, H, Np, Np), lambda i: (i, 0, 0, 0)),
        ),
        compiler_params=pltpu.CompilerParams(
            dimension_semantics=("parallel",)),
    )(attn_bias, inner, t_col)


def graph_attn_bias_forward(params, input_nodes, attn_bias, spatial_pos,
                            input_edges, attn_edge_type, *, num_heads,
                            multi_hop_max_dist):
    """JAX/Pallas port of GraphAttnBias.forward with edge_type='multi_hop'."""
    del attn_edge_type  # TODO(synk): non-multi-hop edge_type branch not implemented.
    emb_edge = params["edge_encoder"]               # (num_edges+1, H)
    emb_spatial = params["spatial_pos_encoder"]     # (num_spatial, H)
    t_w = params["graph_token_virtual_distance"]    # (1, H)
    edge_dis_w = params["edge_dis_encoder"]         # (num_edge_dis*H*H, 1)

    G, N = input_nodes.shape
    H = num_heads
    M = G * N * N

    # --- glue (plain JAX): spatial-pos clamp + data-dependent embedding gathers.
    # TODO(synk): the gathers are data-dependent and stay in XLA; layouts are
    # chosen so heads never end up minor on a big XLA transpose.
    sp_ = jnp.where(spatial_pos == 0, 1, spatial_pos)
    sp_ = jnp.where(sp_ > 1, sp_ - 1, sp_)
    if multi_hop_max_dist > 0:
        sp_ = jnp.clip(sp_, 0, multi_hop_max_dist)
        ie = input_edges[:, :, :, :multi_hop_max_dist, :]
    else:
        ie = input_edges
    D = ie.shape[3]

    # edge embeddings gathered into (H, D, G, N, N); mean over edge features
    iet = jnp.transpose(ie, (3, 0, 1, 2, 4))                 # (D, G, N, N, E) ints
    eT = emb_edge.T                                          # (H, num_edges+1)
    ee = eT[:, iet].mean(axis=-1)                            # (H, D, G, N, N)
    e2 = jnp.transpose(ee, (1, 0, 2, 3, 4)).reshape(D * H, M)   # (D*H, M)

    w_dis = edge_dis_w.reshape(-1, H, H)[:D]                 # (D, H_in, H_out)
    w2 = jnp.transpose(w_dis, (2, 0, 1)).reshape(H, D * H)   # (H_out, D*H_in)

    spb = emb_spatial.T[:, spatial_pos.reshape(-1)]          # (H, M) spatial bias
    sp_f = sp_.astype(jnp.float32).reshape(1, M)             # (1, M) normalizer

    # --- hot path 1: single contraction + normalization + spatial-bias fuse ----
    inner = _inner_bias_pallas(e2, w2, sp_f, spb)            # (H, M)
    inner = inner.reshape(H, G, N, N)                        # free reshape

    # --- hot path 2: fused pad + t + 2*attn_bias assembly -----------------------
    t_col = t_w.reshape(H, 1)
    return _assemble_bias_pallas(attn_bias, inner, t_col)


def _reference_forward(params, input_nodes, attn_bias, spatial_pos, input_edges,
                       attn_edge_type, *, num_heads, multi_hop_max_dist):
    """Pure-JAX transcription of the PyTorch forward, used for validation."""
    del attn_edge_type
    emb_edge = params["edge_encoder"]
    emb_spatial = params["spatial_pos_encoder"]
    t_w = params["graph_token_virtual_distance"]
    edge_dis_w = params["edge_dis_encoder"]

    G, N = input_nodes.shape
    H = num_heads
    Np = N + 1

    gab = jnp.broadcast_to(attn_bias[:, None], (G, H, Np, Np))
    sp_bias = jnp.transpose(emb_spatial[spatial_pos], (0, 3, 1, 2))
    gab = gab.at[:, :, 1:, 1:].add(sp_bias)
    t = t_w.reshape(1, H, 1)
    gab = gab.at[:, :, 1:, 0].add(t)
    gab = gab.at[:, :, 0, :].add(t)

    sp_ = jnp.where(spatial_pos == 0, 1, spatial_pos)
    sp_ = jnp.where(sp_ > 1, sp_ - 1, sp_)
    sp_ = jnp.clip(sp_, 0, multi_hop_max_dist)
    ie = input_edges[:, :, :, :multi_hop_max_dist, :]
    ee = emb_edge[ie].mean(axis=-2)                                   # (G,N,N,D,H)
    D = ee.shape[-2]
    ef = jnp.transpose(ee, (3, 0, 1, 2, 4)).reshape(D, -1, H)
    w = edge_dis_w.reshape(-1, H, H)[:D]
    ef = jnp.einsum('dmh,dhk->dmk', ef, w)
    ee2 = jnp.transpose(ef.reshape(D, G, N, N, H), (1, 2, 3, 0, 4))   # (G,N,N,D,H)
    eb = jnp.transpose(ee2.sum(-2) / sp_.astype(jnp.float32)[..., None],
                       (0, 3, 1, 2))                                  # (G,H,N,N)
    gab = gab.at[:, :, 1:, 1:].add(eb)
    gab = gab + attn_bias[:, None]
    return gab


if __name__ == "__main__":
    # --- module config (small, synthetic) ---
    num_heads = 8
    num_edges = 16
    num_spatial = 12
    num_edge_dis = 6
    multi_hop_max_dist = 4
    # n_layers only affects nn.Linear init (none present) -> irrelevant here.

    G, N, E, D_full = 2, 8, 3, 5
    Np = N + 1

    key = jax.random.PRNGKey(0)
    k = jax.random.split(key, 9)

    # nn.Embedding init per init_params: normal(0, 0.02).  init_params overwrites
    # the padding_idx row too, so no zeroing is applied (matches PyTorch state
    # right after construction).
    params = {
        "edge_encoder": 0.02 * jax.random.normal(
            k[0], (num_edges + 1, num_heads), jnp.float32),
        "spatial_pos_encoder": 0.02 * jax.random.normal(
            k[1], (num_spatial, num_heads), jnp.float32),
        "graph_token_virtual_distance": 0.02 * jax.random.normal(
            k[2], (1, num_heads), jnp.float32),
        "edge_dis_encoder": 0.02 * jax.random.normal(
            k[3], (num_edge_dis * num_heads * num_heads, 1), jnp.float32),
    }

    input_nodes = jax.random.randint(k[4], (G, N), 0, 10, jnp.int32)
    attn_bias = jax.random.normal(k[5], (G, Np, Np), jnp.float32)
    spatial_pos = jax.random.randint(k[6], (G, N, N), 0, num_spatial, jnp.int32)
    input_edges = jax.random.randint(k[7], (G, N, N, D_full, E), 0,
                                     num_edges + 1, jnp.int32)
    attn_edge_type = jax.random.randint(k[8], (G, N, N, E), 0,
                                        num_edges + 1, jnp.int32)

    out = graph_attn_bias_forward(
        params, input_nodes, attn_bias, spatial_pos, input_edges, attn_edge_type,
        num_heads=num_heads, multi_hop_max_dist=multi_hop_max_dist)
    out = jax.block_until_ready(out)

    ref = _reference_forward(
        params, input_nodes, attn_bias, spatial_pos, input_edges, attn_edge_type,
        num_heads=num_heads, multi_hop_max_dist=multi_hop_max_dist)

    assert out.shape == (G, num_heads, Np, Np), out.shape
    max_err = float(jnp.max(jnp.abs(out - ref)))
    assert max_err < 1e-3, f"mismatch vs reference, max abs err = {max_err}"
    print("KERNEL_OK")
</pallas_src>

<mosaic_0001>
module attributes {stable_mosaic.version = 11 : i64} {
  func.func @kernel(%arg0: i32, %arg1: memref<8x32xf32, #tpu.memory_space<vmem>>, %arg2: memref<32x128xf32, #tpu.memory_space<vmem>>, %arg3: memref<1x128xf32, #tpu.memory_space<vmem>>, %arg4: memref<8x128xf32, #tpu.memory_space<vmem>>, %arg5: memref<8x128xf32, #tpu.memory_space<vmem>>) attributes {dimension_semantics = [#tpu.dimension_semantics<parallel>], iteration_bounds = array<i64: 1>, scalar_prefetch = 0 : i64, scratch_operands = 0 : i64, tpu.core_type = #tpu.core_type<tc>, window_params = [{pipeline_mode = #tpu.pipeline_mode<synchronous>, transform_indices = @transform_0, window_bounds = array<i64: 8, 32>}, {transform_indices = @transform_1, window_bounds = array<i64: 32, 128>}, {transform_indices = @transform_2, window_bounds = array<i64: 1, 128>}, {transform_indices = @transform_3, window_bounds = array<i64: 8, 128>}, {transform_indices = @transform_4, window_bounds = array<i64: 8, 128>}]} {
    %c0 = arith.constant 0 : index
    %c0_0 = arith.constant 0 : index
    %0 = vector.load %arg1[%c0, %c0_0] : memref<8x32xf32, #tpu.memory_space<vmem>>, vector<8x32xf32>
    %c0_1 = arith.constant 0 : index
    %c0_2 = arith.constant 0 : index
    %1 = vector.load %arg2[%c0_1, %c0_2] : memref<32x128xf32, #tpu.memory_space<vmem>>, vector<32x128xf32>
    %cst = arith.constant dense<0.000000e+00> : vector<8x128xf32>
    %2 = tpu.matmul %0, %1, %cst {dimension_numbers = #tpu.dot_dimension_numbers<[1], [0], [0], [1], [0, 0, 1, 1], [], []>} : vector<8x32xf32>, vector<32x128xf32>, vector<8x128xf32> -> vector<8x128xf32>
    %c0_3 = arith.constant 0 : index
    %c0_4 = arith.constant 0 : index
    %3 = vector.load %arg3[%c0_3, %c0_4] : memref<1x128xf32, #tpu.memory_space<vmem>>, vector<1x128xf32>
    %4 = tpu.reciprocal %3 {approx = true} : vector<1x128xf32> -> vector<1x128xf32>
    %5 = vector.broadcast %4 : vector<1x128xf32> to vector<8x128xf32>
    %6 = arith.mulf %2, %5 : vector<8x128xf32>
    %c0_5 = arith.constant 0 : index
    %c0_6 = arith.constant 0 : index
    %7 = vector.load %arg4[%c0_5, %c0_6] : memref<8x128xf32, #tpu.memory_space<vmem>>, vector<8x128xf32>
    %8 = arith.addf %6, %7 : vector<8x128xf32>
    %c0_7 = arith.constant 0 : index
    %c0_8 = arith.constant 0 : index
    %9 = vector.load %arg5[%c0_7, %c0_8] : memref<8x128xf32, #tpu.memory_space<vmem>>, vector<8x128xf32>
    tpu.vector_store %arg5[%c0_7, %c0_8], %8 {strides = array<i32>} : memref<8x128xf32, #tpu.memory_space<vmem>>, vector<8x128xf32>,
    return
  }
  func.func @transform_0(%arg0: i32) -> (i32, i32) {
    %c0_i32 = arith.constant 0 : i32
    %c0_i32_0 = arith.constant 0 : i32
    %c0_i32_1 = arith.constant 0 : i32
    return %c0_i32, %c0_i32_0 : i32, i32
  }
  func.func @transform_1(%arg0: i32) -> (i32, i32) {
    %c0_i32 = arith.constant 0 : i32
    %c0_i32_0 = arith.constant 0 : i32
    return %c0_i32, %arg0 : i32, i32
  }
  func.func @transform_2(%arg0: i32) -> (i32, i32) {
    %c0_i32 = arith.constant 0 : i32
    %c0_i32_0 = arith.constant 0 : i32
    return %c0_i32, %arg0 : i32, i32
  }
  func.func @transform_3(%arg0: i32) -> (i32, i32) {
    %c0_i32 = arith.constant 0 : i32
    %c0_i32_0 = arith.constant 0 : i32
    return %c0_i32, %arg0 : i32, i32
  }
  func.func @transform_4(%arg0: i32) -> (i32, i32) {
    %c0_i32 = arith.constant 0 : i32
    %c0_i32_0 = arith.constant 0 : i32
    return %c0_i32, %arg0 : i32, i32
  }
}

</mosaic_0001>

<bundles_post_ra>
// kernel: tpu_custom_call.1
= control target key start
LH: loop header
LB: loop body
LE: loop exit
PB: predicated region body
PF: predicated region fallthrough
CT: control target
= control target key end

     0   :  { %9 = vsyncpa [#allocation3], 0  ;;  %s338_s0 = inlined_call_operand.hbm [shape: f32[8,32], index: 0, kind: input, shape index: {}]   ;;  %s339_s1 = inlined_call_operand.hbm [shape: f32[32,128], index: 1, kind: input, shape index: {}]   ;;  %s340_s2 = inlined_call_operand.vmem [shape: f32[1,128], index: 2, kind: input, shape index: {}]   ;;  %s341_s3 = inlined_call_operand.vmem [shape: f32[8,128], index: 3, kind: input, shape index: {}]   ;;  %s342_s4 = inlined_call_operand.hbm [shape: f32[8,128], index: 4, kind: output, shape index: {}]  }
   0x1   :  { %10 = vsyncpa [#allocation6], 0 }
   0x2   :  { %11 = vsyncpa [#allocation4], 0  ;;  %s256_s15 = smov [#allocation2]   ;;  %s257_s17 = smov [#allocation5]  }
   0x3   :  { %s18_s16 = sshll.u32 %s256_s15, 4  ;;  %s27_s18 = sshll.u32 %s257_s17, 4  ;;  %s19_s16 = int_to_ptr.vmem [resolvable:$true] %s18_s16  ;;  %s289_s18 = int_to_ptr.vmem [resolvable:$true] %s27_s18 }
   0x4   :  { %s184_s21 = scalar_lea.hbm %s338_s0, 128 }
   0x5   :  { %p185_p0 = scmp.ne.s32.totalorder %s338_s0, %s184_s21  ;;  %p188_p1 = scmp.lt.u32.totalorder %s184_s21, %s338_s0 }
   0x7   :  { %p190_p2 = pnand %p188_p1, %p185_p0 }
   0x9   :  { %193 = shalt.err (!%p190_p2)
}
   0xa   :  { %s194_s26 = scalar_lea.vmem %s19_s16, 128  ;;  %p199_p4 = scmp.lt.s32.totalorder %s19_s16, %s19_s16 }
   0xb   :  { %p195_p3 = scmp.ne.s32.totalorder %s19_s16, %s194_s26  ;;  %p200_p5 = scmp.lt.s32.totalorder %s194_s26, %s194_s26 }
   0xd   :  { %p201_p6 = por %p200_p5, %p199_p4 }
   0xf   :  { %p202_p7 = pnand %p201_p6, %p195_p3 }
  0x11   :  { %205 = shalt.err (!%p202_p7)
}
  0x12   :  { %21 = dma.hbm_to_vmem [thread:$0]  %s338_s0, 128, %s19_s16, [#allocation3]  }
  0x13   :  { %s206_s5 = scalar_lea.hbm %s339_s1, 512 }
  0x14   :  { %p207_p8 = scmp.ne.s32.totalorder %s339_s1, %s206_s5  ;;  %p210_p9 = scmp.lt.u32.totalorder %s206_s5, %s339_s1 }
  0x16   :  { %p212_p10 = pnand %p210_p9, %p207_p8 }
  0x18   :  { %215 = shalt.err (!%p212_p10)
}
  0x19   :  { %s216_s10 = scalar_lea.vmem %s289_s18, 512  ;;  %p221_p12 = scmp.lt.s32.totalorder %s289_s18, %s289_s18 }
  0x1a   :  { %p217_p11 = scmp.ne.s32.totalorder %s289_s18, %s216_s10  ;;  %p222_p13 = scmp.lt.s32.totalorder %s216_s10, %s216_s10 }
  0x1c   :  { %p223_p0 = por %p222_p13, %p221_p12 }
  0x1e   :  { %p224_p1 = pnand %p223_p0, %p217_p11 }
  0x20   :  { %227 = shalt.err (!%p224_p1)
}
  0x21   :  { %s258_s0 = smov 128   ;;  %s259_s11 = smov 8  }
  0x22   :  { %33 = dma.hbm_to_vmem [thread:$0]  %s339_s1, 512, %s289_s18, [#allocation6], %s258_s0, %s258_s0, %s259_s11  }
  0x23   :  { %250 = dma.done.wait [#allocation3], 128  }
  0x24   :  { %251 = vsyncadd [#allocation3], 4294967168 }
  0x25   :  { %252 = dma.done.wait [#allocation6], 512  }
  0x26   :  { %253 = vsyncadd [#allocation6], 4294966784  ;;  %v260_v0 = vmov 0.0|0.0   ;;  %vm261_vm0 = vmmov 0   ;;  %v262_v1 = vmov 0.0   ;;  %v45_v2 = vld [vmem:[#allocation5] sm:$0xff]  ;;  %v126_v10 = vlaneseq }
  0x27   :  { %168 = vmatprep.subr.bf16.mxu0 %v260_v0  ;;  %165 = vmatprep.mubr.msk.f32.mxu0 %vm261_vm0, %v262_v1  ;;  %v46_v3 = vld [vmem:[#allocation5 + $0x8] sm:$0xff]  ;;  %v47_v4 = vld [vmem:[#allocation5 + $0x10] sm:$0xff]  ;;  %v48_v6 = vld [vmem:[#allocation5 + $0x18] sm:$0xff]  ;;  %vm49_vm1 = vcmask 261120   ;;  %s263_s17 = smov [#allocation7]  }
  0x28   :  { %v169_v5 = vpack.c.bf16 %v46_v3, %v45_v2  ;;  %v172_v7 = vpack.c.bf16 %v48_v6, %v47_v4  ;;  %v44_v8 = vld [vmem:[#allocation2] sm:$0xff]  ;;  %v127_v11 = vshrl.u32 %v126_v10, 7  ;;  %s141_s18 = sshll.u32 %s263_s17, 4  ;;  %s142_s18 = int_to_ptr.vmem [resolvable:$true] %s141_s18 }
  0x29   :  { %v123_v9 = vld [vmem:[%s340_s2] sm:$0x1]  ;;  %s228_s19 = scalar_lea.vmem %s142_s18, 128  ;;  %p233_p3 = scmp.lt.s32.totalorder %s142_s18, %s142_s18 }
  0x2a   :  { %170 = vmatpush3.bf16.msra.mxu0 %v169_v5  ;;  %182 = vrcp.f32 %v123_v9  ;;  %v128_v12 = vsub.s32 0, %v127_v11  ;;  %v132_v16 = vld [vmem:[%s341_s3] sm:$0xff]  ;;  %p229_p2 = scmp.ne.s32.totalorder %s142_s18, %s228_s19  ;;  %p234_p4 = scmp.lt.s32.totalorder %s228_s19, %s228_s19 }
  0x2b   :  { %171 = vmatprep.subr.bf16.mxu0 %v260_v0 }
  0x2c   :  { %p235_p5 = por %p234_p4, %p233_p3 }
  0x2e   :  { %173 = vmatpush3.bf16.msra.mxu0 %v172_v7  ;;  %p236_p6 = pnand %p235_p5, %p229_p2 }
  0x31   :  { %166 = vmatmul.mubr.msk.f32.vlgmr.msra.gmra.mrb[0].mxu0 %vm49_vm1, %v44_v8 }
  0x34   :  { %v183_v13 = vpop.eup %182 }
  0x35   :  { %v129_v14 = vrot.slane %v183_v13, %v128_v12 }
 0x104   :  { %v119_v15 = vpop.f32.mrb[0].mxu0 }
 0x105   :  { %v131_v17 = vmul.f32 %v129_v14, %v119_v15  ;;  %v167_v18 = vpop.f32.mrb[1].mxu0 }
 0x107   :  { %v133_v19 = vadd.f32 %v132_v16, %v131_v17 }
 0x109   :  { %134 = vst [vmem:[#allocation7] sm:$0xff] %v133_v19 }
 0x10a   :  { %239 = shalt.err (!%p236_p6)
}
 0x10b   :  { %s240_s21 = scalar_lea.hbm %s342_s4, 128 }
 0x10c   :  { %p241_p7 = scmp.ne.s32.totalorder %s342_s4, %s240_s21  ;;  %p244_p8 = scmp.lt.u32.totalorder %s240_s21, %s342_s4 }
 0x10e   :  { %p246_p9 = pnand %p244_p8, %p241_p7 }
 0x110   :  { %249 = shalt.err (!%p246_p9)
}
 0x111   :  { %144 = dma.vmem_to_hbm [thread:$0]  %s142_s18, 128, %s342_s4, [#allocation4]  }
 0x112   :  { %254 = dma.done.wait [#allocation4], 128  }
 0x113   :  { %255 = vsyncadd [#allocation4], 4294967168 }
 0x114   :  { %148 = vsyncpa [#allocation3], 1 }
 0x115   :  { %149 = vsyncpa [#allocation6], 1 }
 0x116   :  { %150 = vsyncpa [#allocation4], 1 }

</bundles_post_ra>
